<compile_context>
chip_gen: v5e
topology: v5e:2x2
jax: 0.10.0
libtpu: 0.0.40
codegen_flags: <defaults>
</compile_context>

<pallas_src>
import functools

import jax
import jax.numpy as jnp
import numpy as np
from jax.experimental import pallas as pl
from jax.experimental.pallas import tpu as pltpu


def _round_up(x: int, m: int) -> int:
    return ((x + m - 1) // m) * m


def _vmem_cap_bytes() -> int:
    """Generation-aware scoped-VMEM cap (leave headroom under physical VMEM)."""
    try:
        cap = int(pltpu.get_tpu_info().vmem_capacity_bytes)
    except Exception:
        cap = 64 * 1024 * 1024  # v7x per-TC worst case
    return max(cap - 16 * 1024 * 1024, 32 * 1024 * 1024)


def mlp_kernel(x_ref, w1_ref, b1_ref, w2_ref, b2_ref, o_ref):
    # Layer 1: Linear(in_dim -> H) on the MXU (operands already in matmul dtype,
    # f32 accumulation via preferred_element_type); bias + tanh in f32 (VPU/EUP).
    h = jnp.tanh(
        jnp.dot(x_ref[...], w1_ref[...], preferred_element_type=jnp.float32)
        + b1_ref[0, :]
    )
    # Layer 2: Linear(H -> C). Output stored directly in its unpadded width.
    out = jnp.dot(h.astype(w2_ref.dtype), w2_ref[...],
                  preferred_element_type=jnp.float32)
    o_ref[...] = (out + b2_ref[0, :]).astype(o_ref.dtype)


def mlp_forward(x, w1, b1, w2, b2, *, tile_b=2048, matmul_dtype=jnp.bfloat16):
    """Fused MLP forward:  out = tanh(x @ w1 + b1) @ w2 + b2

    x:  (B, in_dim)
    w1: (in_dim, H), b1: (1, H)
    w2: (H, C),      b2: (1, C)
    returns (B, C) float32
    """
    B, in_dim = x.shape
    H = w1.shape[1]
    C = w2.shape[1]

    md = jnp.dtype(matmul_dtype)
    bpe_act = md.itemsize  # 2 for bf16 operands, 4 for f32

    # Cast MXU operands once in the wrapper (halves streamed x bytes for bf16 and
    # avoids re-casting the VMEM-resident weights every grid step). Biases and
    # all accumulation / activation math stay f32.
    x = x.astype(md)
    w1 = w1.astype(md)
    w2 = w2.astype(md)
    b1 = b1.astype(jnp.float32)
    b2 = b2.astype(jnp.float32)

    # --- Choose a sublane-aligned batch tile (don't trust caller values).
    align = 16 if bpe_act == 2 else 8
    tile_b = int(tile_b)
    tile_b = max(align, min(tile_b, _round_up(B, align)))
    tile_b = _round_up(tile_b, align)
    # Prefer >= 2 balanced tiles so the "parallel" batch axis can use both
    # TensorCores on v7x (only when the batch is big enough to split).
    if _round_up(B, tile_b) // tile_b < 2 and tile_b >= 2 * align and B > align:
        tile_b = _round_up((tile_b + 1) // 2, align)

    B_pad = _round_up(B, tile_b)
    if B_pad != B:
        x = jnp.pad(x, ((0, B_pad - B), (0, 0)))
    n_tiles = B_pad // tile_b

    # --- Explicit VMEM budget, clamped to the generation's physical capacity.
    vmem_bytes = (
        2 * tile_b * in_dim * bpe_act        # double-buffered x tiles
        + 2 * tile_b * C * 4                 # double-buffered f32 output tiles
        + (in_dim * H + H * C) * bpe_act     # resident weights
        + (H + C) * 4                        # resident biases
        + 2 * tile_b * H * 4                 # f32 hidden activation + slack
    )
    vmem_limit = int(min(max(2 * vmem_bytes, 16 * 1024 * 1024), _vmem_cap_bytes()))

    cost = pl.CostEstimate(
        flops=2 * B_pad * (in_dim * H + H * C),
        transcendentals=B_pad * H,
        bytes_accessed=(B_pad * in_dim * bpe_act + B_pad * C * 4
                        + (in_dim * H + H * C) * bpe_act + (H + C) * 4),
    )

    out = pl.pallas_call(
        mlp_kernel,
        out_shape=jax.ShapeDtypeStruct((B_pad, C), jnp.float32),
        grid=(n_tiles,),
        in_specs=[
            pl.BlockSpec((tile_b, in_dim), lambda i: (i, 0)),  # x tiles stream
            pl.BlockSpec((in_dim, H), lambda i: (0, 0)),       # w1 resident
            pl.BlockSpec((1, H), lambda i: (0, 0)),            # b1 resident
            pl.BlockSpec((H, C), lambda i: (0, 0)),            # w2 resident
            pl.BlockSpec((1, C), lambda i: (0, 0)),            # b2 resident
        ],
        out_specs=pl.BlockSpec((tile_b, C), lambda i: (i, 0)),
        compiler_params=pltpu.CompilerParams(
            dimension_semantics=("parallel",),  # batch tiles shard across TCs
            vmem_limit_bytes=vmem_limit,
        ),
        cost_estimate=cost,
    )(x, w1, b1, w2, b2)

    return out[:B]


def xavier_uniform(key, fan_in, fan_out):
    # matches torch.nn.init.xavier_uniform_ bound
    bound = float(np.sqrt(6.0 / (fan_in + fan_out)))
    return jax.random.uniform(
        key, (fan_in, fan_out), dtype=jnp.float32, minval=-bound, maxval=bound
    )


if __name__ == "__main__":
    # Small shapes consistent with the module: x is (batch, in_dim), hidden=128.
    batch, in_dim, hidden, num_class = 8, 32, 128, 10

    key = jax.random.PRNGKey(0)
    kx, kw1, kw2 = jax.random.split(key, 3)

    x = jax.random.normal(kx, (batch, in_dim), dtype=jnp.float32)

    # Deterministic init mirroring MLP.init_weights: xavier_uniform, bias = 0.001
    w1 = xavier_uniform(kw1, in_dim, hidden)      # Linear(in_dim, 128) weight^T
    b1 = jnp.full((1, hidden), 0.001, dtype=jnp.float32)
    w2 = xavier_uniform(kw2, hidden, num_class)   # Linear(128, num_class) weight^T
    b2 = jnp.full((1, num_class), 0.001, dtype=jnp.float32)

    # Pure-JAX reference (same math as torch Sequential forward).
    ref_fn = lambda xx: jnp.tanh(xx @ w1 + b1) @ w2 + b2

    # 1) Exact f32 path (strict tolerance) — single tile.
    out_f32 = mlp_forward(x, w1, b1, w2, b2, matmul_dtype=jnp.float32)
    out_f32 = jax.block_until_ready(out_f32)
    np.testing.assert_allclose(np.asarray(out_f32), np.asarray(ref_fn(x)),
                               rtol=1e-5, atol=1e-5)
    assert out_f32.shape == (batch, num_class)

    # 2) Default bf16-MXU-operand path (f32 accumulation) — loose tolerance.
    out_bf16 = jax.block_until_ready(mlp_forward(x, w1, b1, w2, b2))
    np.testing.assert_allclose(np.asarray(out_bf16), np.asarray(ref_fn(x)),
                               rtol=3e-2, atol=3e-2)
    assert out_bf16.shape == (batch, num_class)

    # 3) Multi-tile path (exercises batch grid + padding): B=20, small tile.
    x2 = jax.random.normal(jax.random.PRNGKey(1), (20, in_dim), dtype=jnp.float32)
    out2 = jax.block_until_ready(mlp_forward(x2, w1, b1, w2, b2, tile_b=8))
    np.testing.assert_allclose(np.asarray(out2), np.asarray(ref_fn(x2)),
                               rtol=3e-2, atol=3e-2)
    assert out2.shape == (20, num_class)

    # 4) Multi-tile exact f32 check as well.
    out3 = jax.block_until_ready(
        mlp_forward(x2, w1, b1, w2, b2, tile_b=8, matmul_dtype=jnp.float32))
    np.testing.assert_allclose(np.asarray(out3), np.asarray(ref_fn(x2)),
                               rtol=1e-5, atol=1e-5)

    print("KERNEL_OK")
</pallas_src>

<mosaic_0001>
module attributes {stable_mosaic.version = 11 : i64} {
  func.func @mlp_kernel(%arg0: i32, %arg1: memref<8x32xf32, #tpu.memory_space<vmem>>, %arg2: memref<32x128xf32, #tpu.memory_space<vmem>>, %arg3: memref<1x128xf32, #tpu.memory_space<vmem>>, %arg4: memref<128x10xf32, #tpu.memory_space<vmem>>, %arg5: memref<1x10xf32, #tpu.memory_space<vmem>>, %arg6: memref<8x10xf32, #tpu.memory_space<vmem>>) attributes {dimension_semantics = [#tpu.dimension_semantics<parallel>], iteration_bounds = array<i64: 1>, scalar_prefetch = 0 : i64, scratch_operands = 0 : i64, tpu.core_type = #tpu.core_type<tc>, window_params = [{transform_indices = @transform_0, window_bounds = array<i64: 8, 32>}, {pipeline_mode = #tpu.pipeline_mode<synchronous>, transform_indices = @transform_1, window_bounds = array<i64: 32, 128>}, {pipeline_mode = #tpu.pipeline_mode<synchronous>, transform_indices = @transform_2, window_bounds = array<i64: 1, 128>}, {pipeline_mode = #tpu.pipeline_mode<synchronous>, transform_indices = @transform_3, window_bounds = array<i64: 128, 10>}, {pipeline_mode = #tpu.pipeline_mode<synchronous>, transform_indices = @transform_4, window_bounds = array<i64: 1, 10>}, {transform_indices = @transform_5, window_bounds = array<i64: 8, 10>}]} {
    %c0 = arith.constant 0 : index
    %c0_0 = arith.constant 0 : index
    %0 = vector.load %arg1[%c0, %c0_0] : memref<8x32xf32, #tpu.memory_space<vmem>>, vector<8x32xf32>
    %c0_1 = arith.constant 0 : index
    %c0_2 = arith.constant 0 : index
    %1 = vector.load %arg2[%c0_1, %c0_2] : memref<32x128xf32, #tpu.memory_space<vmem>>, vector<32x128xf32>
    %cst = arith.constant dense<0.000000e+00> : vector<8x128xf32>
    %2 = tpu.matmul %0, %1, %cst {dimension_numbers = #tpu.dot_dimension_numbers<[1], [0], [0], [1], [0, 0, 1, 1], [], []>} : vector<8x32xf32>, vector<32x128xf32>, vector<8x128xf32> -> vector<8x128xf32>
    %c0_3 = arith.constant 0 : index
    %c0_4 = arith.constant 0 : index
    %3 = vector.load %arg3[%c0_3, %c0_4] : memref<1x128xf32, #tpu.memory_space<vmem>>, vector<1x128xf32>
    %4 = vector.shape_cast %3 : vector<1x128xf32> to vector<128xf32>
    %5 = vector.shape_cast %4 : vector<128xf32> to vector<1x128xf32>
    %6 = vector.broadcast %5 : vector<1x128xf32> to vector<8x128xf32>
    %7 = arith.addf %2, %6 : vector<8x128xf32>
    %8 = math.tanh %7 : vector<8x128xf32>
    %c0_5 = arith.constant 0 : index
    %c0_6 = arith.constant 0 : index
    %9 = vector.load %arg4[%c0_5, %c0_6] : memref<128x10xf32, #tpu.memory_space<vmem>>, vector<128x10xf32>
    %cst_7 = arith.constant dense<0.000000e+00> : vector<8x10xf32>
    %10 = tpu.matmul %8, %9, %cst_7 {dimension_numbers = #tpu.dot_dimension_numbers<[1], [0], [0], [1], [0, 0, 1, 1], [], []>} : vector<8x128xf32>, vector<128x10xf32>, vector<8x10xf32> -> vector<8x10xf32>
    %c0_8 = arith.constant 0 : index
    %c0_9 = arith.constant 0 : index
    %11 = vector.load %arg5[%c0_8, %c0_9] : memref<1x10xf32, #tpu.memory_space<vmem>>, vector<1x10xf32>
    %12 = vector.shape_cast %11 : vector<1x10xf32> to vector<10xf32>
    %13 = vector.shape_cast %12 : vector<10xf32> to vector<1x10xf32>
    %14 = vector.broadcast %13 : vector<1x10xf32> to vector<8x10xf32>
    %15 = arith.addf %10, %14 : vector<8x10xf32>
    %c0_10 = arith.constant 0 : index
    %c0_11 = arith.constant 0 : index
    %16 = vector.load %arg6[%c0_10, %c0_11] : memref<8x10xf32, #tpu.memory_space<vmem>>, vector<8x10xf32>
    tpu.vector_store %arg6[%c0_10, %c0_11], %15 {strides = array<i32>} : memref<8x10xf32, #tpu.memory_space<vmem>>, vector<8x10xf32>,
    return
  }
  func.func @transform_0(%arg0: i32) -> (i32, i32) {
    %c0_i32 = arith.constant 0 : i32
    %c0_i32_0 = arith.constant 0 : i32
    return %arg0, %c0_i32 : i32, i32
  }
  func.func @transform_1(%arg0: i32) -> (i32, i32) {
    %c0_i32 = arith.constant 0 : i32
    %c0_i32_0 = arith.constant 0 : i32
    %c0_i32_1 = arith.constant 0 : i32
    return %c0_i32, %c0_i32_0 : i32, i32
  }
  func.func @transform_2(%arg0: i32) -> (i32, i32) {
    %c0_i32 = arith.constant 0 : i32
    %c0_i32_0 = arith.constant 0 : i32
    %c0_i32_1 = arith.constant 0 : i32
    return %c0_i32, %c0_i32_0 : i32, i32
  }
  func.func @transform_3(%arg0: i32) -> (i32, i32) {
    %c0_i32 = arith.constant 0 : i32
    %c0_i32_0 = arith.constant 0 : i32
    %c0_i32_1 = arith.constant 0 : i32
    return %c0_i32, %c0_i32_0 : i32, i32
  }
  func.func @transform_4(%arg0: i32) -> (i32, i32) {
    %c0_i32 = arith.constant 0 : i32
    %c0_i32_0 = arith.constant 0 : i32
    %c0_i32_1 = arith.constant 0 : i32
    return %c0_i32, %c0_i32_0 : i32, i32
  }
  func.func @transform_5(%arg0: i32) -> (i32, i32) {
    %c0_i32 = arith.constant 0 : i32
    %c0_i32_0 = arith.constant 0 : i32
    return %arg0, %c0_i32 : i32, i32
  }
}

</mosaic_0001>

<bundles_post_ra>
// kernel: tpu_custom_call.1
= control target key start
LH: loop header
LB: loop body
LE: loop exit
PB: predicated region body
PF: predicated region fallthrough
CT: control target
= control target key end

     0   :  { %vm30_vm0 = vcmask 261120   ;;  %s248_s0 = inlined_call_operand.vmem [shape: f32[8,32], index: 0, kind: input, shape index: {}]   ;;  %s249_s1 = inlined_call_operand.vmem [shape: f32[32,128], index: 1, kind: input, shape index: {}]   ;;  %s250_s2 = inlined_call_operand.vmem [shape: f32[1,128], index: 2, kind: input, shape index: {}]   ;;  %s251_s3 = inlined_call_operand.vmem [shape: f32[128,10], index: 3, kind: input, shape index: {}]   ;;  %s252_s4 = inlined_call_operand.vmem [shape: f32[1,10], index: 4, kind: input, shape index: {}]   ;;  %s253_s5 = inlined_call_operand.hbm [shape: f32[8,10], index: 5, kind: output, shape index: {}]  }
   0x1   :  { %v25_v0 = vld [vmem:[%s249_s1 + $0x18] sm:$0xff]  ;;  %v24_v1 = vld [vmem:[%s249_s1 + $0x10] sm:$0xff]  ;;  %v23_v3 = vld [vmem:[%s249_s1 + $0x8] sm:$0xff] }
   0x2   :  { %46 = vmatpush.msra.mxu0 %v25_v0  ;;  %v70_v2 = vld [vmem:[%s251_s3 + $0x78] sm:$0xff]  ;;  %v69_v4 = vld [vmem:[%s251_s3 + $0x70] sm:$0xff]  ;;  %v68_v5 = vld [vmem:[%s251_s3 + $0x68] sm:$0xff] }
   0x3   :  { %75 = vmatpush.msra.mxu1 %v70_v2  ;;  %v22_v6 = vld [vmem:[%s249_s1] sm:$0xff] }
   0x4   :  { %47 = vmatpush.msra.mxu0 %v24_v1  ;;  %v21_v7 = vld [vmem:[%s248_s0] sm:$0xff] }
   0x5   :  { %76 = vmatpush.msra.mxu1 %v69_v4  ;;  %v67_v8 = vld [vmem:[%s251_s3 + $0x60] sm:$0xff] }
   0x6   :  { %48 = vmatpush.msra.mxu0 %v23_v3 }
   0x7   :  { %77 = vmatpush.msra.mxu1 %v68_v5 }
   0x8   :  { %10 = vsyncpa [#allocation3], 0  ;;  %49 = vmatpush.msra.mxu0 %v22_v6  ;;  %v66_v9 = vld [vmem:[%s251_s3 + $0x58] sm:$0xff]  ;;  %v65_v10 = vld [vmem:[%s251_s3 + $0x50] sm:$0xff]  ;;  %s145_s12 = smov [#allocation2]   ;;  %vm95_vm1 = vcmask 80896  }
   0x9   :  { %113 = vmatmul.msk.f32.vlgmr.msra.gmra.mxu0 %vm30_vm0, %v21_v7  ;;  %78 = vmatpush.msra.mxu1 %v67_v8  ;;  %v64_v11 = vld [vmem:[%s251_s3 + $0x48] sm:$0xff]  ;;  %v63_v12 = vld [vmem:[%s251_s3 + $0x40] sm:$0xff]  ;;  %v62_v13 = vld [vmem:[%s251_s3 + $0x38] sm:$0xff]  ;;  %s102_s1 = sshll.u32 %s145_s12, 4  ;;  %s103_s1 = int_to_ptr.vmem [resolvable:$true] %s102_s1 }
   0xa   :  { %v61_v14 = vld [vmem:[%s251_s3 + $0x30] sm:$0xff]  ;;  %v60_v15 = vld [vmem:[%s251_s3 + $0x28] sm:$0xff]  ;;  %v59_v16 = vld [vmem:[%s251_s3 + $0x20] sm:$0xff] }
   0xb   :  { %79 = vmatpush.msra.mxu1 %v66_v9  ;;  %v58_v17 = vld [vmem:[%s251_s3 + $0x18] sm:$0xff]  ;;  %v57_v18 = vld [vmem:[%s251_s3 + $0x10] sm:$0xff]  ;;  %v56_v19 = vld [vmem:[%s251_s3 + $0x8] sm:$0xff] }
   0xc   :  { %v55_v20 = vld [vmem:[%s251_s3] sm:$0xff]  ;;  %s104_s3 = sshll.u32 %s253_s5, 4  ;;  %s105_s3 = int_to_ptr.hbm [resolvable:$true] %s104_s3 }
   0xd   :  { %80 = vmatpush.msra.mxu1 %v65_v10  ;;  %v115_v21 = vld [vmem:[%s250_s2] ss:$0 sm:$0xff] }
   0xe   :  { %v116_v25 = vld [vmem:[%s252_s4] ss:$0 sm:$0xff] }
   0xf   :  { %81 = vmatpush.msra.mxu1 %v64_v11 }
  0x11   :  { %82 = vmatpush.msra.mxu1 %v63_v12 }
  0x13   :  { %83 = vmatpush.msra.mxu1 %v62_v13 }
  0x15   :  { %84 = vmatpush.msra.mxu1 %v61_v14 }
  0x17   :  { %85 = vmatpush.msra.mxu1 %v60_v15 }
  0x19   :  { %86 = vmatpush.msra.mxu1 %v59_v16 }
  0x1b   :  { %87 = vmatpush.msra.mxu1 %v58_v17 }
  0x1d   :  { %88 = vmatpush.msra.mxu1 %v57_v18 }
  0x1f   :  { %89 = vmatpush.msra.mxu1 %v56_v19 }
  0x21   :  { %90 = vmatpush.msra.mxu1 %v55_v20 }
  0x86   :  { %v51_v22 = vpop.f32.mrf.mxu0 }
  0x87   :  { %v52_v23 = vadd.f32 %v115_v21, %v51_v22 }
  0x89   :  { %117 = vtanh.f32 %v52_v23 }
  0x8f   :  { %v118_v24 = vpop.eup %117 }
  0x90   :  { %91 = vmatmul.f32.vlgmr.msra.gmra.mxu1 %v118_v24 }
 0x10d   :  { %v92_v26 = vpop.f32.mrf.mxu1 }
 0x10e   :  { %v93_v27 = vadd.f32 %v116_v25, %v92_v26 }
 0x110   :  { %96 = vst.msk [vmem:[#allocation2] sm:$0xff] %vm95_vm1, %v93_v27 }
 0x111   :  { %107 = dma.vmem_to_hbm [thread:$0]  %s103_s1, 128, %s105_s3, [#allocation3]  }
 0x112   :  { %143 = dma.done.wait [#allocation3], 128  }
 0x113   :  { %144 = vsyncadd [#allocation3], 4294967168 }
 0x114   :  { %112 = vsyncpa [#allocation3], 1 }

</bundles_post_ra>
